<compile_context>
chip_gen: v7x
topology: tpu7x:2x2x1
jax: 0.10.0
libtpu: 0.0.40
codegen_flags: <defaults>
</compile_context>

<pallas_src>
import jax
import jax.numpy as jnp
from jax.experimental import pallas as pl
from jax.experimental.pallas import tpu as pltpu


def _sublane_multiple(dtype) -> int:
    """Minimum second-to-last block-dim multiple for a dtype on TPU."""
    itemsize = jnp.dtype(dtype).itemsize
    if itemsize >= 4:
        return 8
    if itemsize == 2:
        return 16
    return 32  # int8 / fp8


def _round_up(x: int, m: int) -> int:
    return ((x + m - 1) // m) * m


def _innerproduct_kernel(x_ref, w_ref, o_ref, acc_ref):
    # Canonical accumulator pattern over the K (features_in) grid axis.
    @pl.when(pl.program_id(2) == 0)
    def _():
        acc_ref[...] = jnp.zeros_like(acc_ref)

    acc_ref[...] += jnp.dot(
        x_ref[...], w_ref[...], preferred_element_type=jnp.float32
    )

    @pl.when(pl.program_id(2) == pl.num_programs(2) - 1)
    def _():
        o_ref[...] = acc_ref[...].astype(o_ref.dtype)


def inner_product(x, weight, *, tm=None, tn=None, tk=None,
                  allow_small_fallback=True):
    """Computes x @ weight with a tiled, padded Pallas matmul kernel."""
    M, K = x.shape
    K2, N = weight.shape
    assert K == K2, "features_in mismatch"
    out_dtype = x.dtype

    # Small-shape fast path: per-call + per-step overhead dwarfs the MXU work.
    if allow_small_fallback and 2 * M * N * K < (1 << 22):
        return jnp.dot(x, weight, preferred_element_type=jnp.float32).astype(out_dtype)

    # --- Tile selection (hardware-aware defaults, dtype-aware rounding) -----
    # Sublane constraint applies to the second-to-last dim of each block:
    #   x block (tm, tk): tm      ; w block (tk, tn): tk ; out block (tm, tn): tm
    # Lane constraint (multiple of 128) applies to tk (x) and tn (w, out).
    sub_m = max(_sublane_multiple(x.dtype), _sublane_multiple(out_dtype))
    if tm is None:
        tm = min(256, _round_up(M, sub_m))      # 256-aligned keeps v6e/v7x MXU fed
    if tn is None:
        tn = min(256, _round_up(N, 128))        # lane-dense output (>=128)
    if tk is None:
        tk = min(512, _round_up(K, 128))        # big-ish K step amortizes grid overhead
    # Enforce constraints on user-supplied tiles too (avoids lowering failures).
    tm = _round_up(tm, sub_m)
    tn = _round_up(tn, 128)
    tk = _round_up(tk, 128)

    # --- Pad to tile multiples (zeros along K contribute nothing) -----------
    Mp, Kp, Np = _round_up(M, tm), _round_up(K, tk), _round_up(N, tn)
    xp = x if (Mp == M and Kp == K) else jnp.pad(x, ((0, Mp - M), (0, Kp - K)))
    wp = weight if (Kp == K and Np == N) else jnp.pad(weight, ((0, Kp - K), (0, Np - N)))

    grid = (Mp // tm, Np // tn, Kp // tk)

    # --- VMEM budget (double-buffered inputs/output + f32 acc scratch) ------
    xb = jnp.dtype(x.dtype).itemsize
    wb = jnp.dtype(weight.dtype).itemsize
    ob = jnp.dtype(out_dtype).itemsize
    footprint = 2 * (tm * tk * xb + tk * tn * wb + tm * tn * ob) + tm * tn * 4
    # Default tiles use only a few MiB; 32 MiB is safe on v5e/v6e/v7x and raises
    # v5e's 16 MiB scoped default. Larger user tiles get proportionally more.
    vmem_limit = int(min(max(32 << 20, 2 * footprint), 64 << 20))

    cost = pl.CostEstimate(
        flops=2 * Mp * Np * Kp,
        transcendentals=0,
        bytes_accessed=Mp * Kp * xb + Kp * Np * wb + Mp * Np * ob,
    )

    out_p = pl.pallas_call(
        _innerproduct_kernel,
        out_shape=jax.ShapeDtypeStruct((Mp, Np), out_dtype),
        grid_spec=pltpu.PrefetchScalarGridSpec(
            num_scalar_prefetch=0,
            grid=grid,
            in_specs=[
                pl.BlockSpec((tm, tk), lambda i, j, k: (i, k)),
                pl.BlockSpec((tk, tn), lambda i, j, k: (k, j)),
            ],
            out_specs=pl.BlockSpec((tm, tn), lambda i, j, k: (i, j)),
            scratch_shapes=[pltpu.VMEM((tm, tn), jnp.float32)],
        ),
        compiler_params=pltpu.CompilerParams(
            # M/N parallel (megacore sharding on v7x), K is the reduction axis.
            dimension_semantics=("parallel", "parallel", "arbitrary"),
            vmem_limit_bytes=vmem_limit,
        ),
        cost_estimate=cost,
    )(xp, wp)

    if Mp != M or Np != N:
        out_p = out_p[:M, :N]
    return out_p


if __name__ == "__main__":
    key = jax.random.PRNGKey(0)
    k1, k2, k3, k4 = jax.random.split(key, 4)

    # --- Test 1: small module-like shapes (batch=8, in=32, out=64), f32. ----
    # Force the Pallas path (fast path would otherwise use plain jnp.dot).
    x = jax.random.normal(k1, (8, 32), dtype=jnp.float32)
    w = jax.random.normal(k2, (32, 64), dtype=jnp.float32) * 0.02
    out = jax.block_until_ready(inner_product(x, w, allow_small_fallback=False))
    ref = x @ w
    assert out.shape == (8, 64)
    assert jnp.allclose(out, ref, atol=1e-5, rtol=1e-5), "f32 mismatch vs reference"
    # The default (fallback-enabled) path must match too.
    out_fb = jax.block_until_ready(inner_product(x, w))
    assert jnp.allclose(out_fb, ref, atol=1e-5, rtol=1e-5), "fallback mismatch"

    # --- Test 2: non-divisible bf16 shapes -> padding + multi-step grid. ----
    xb = (jax.random.normal(k3, (192, 640), dtype=jnp.float32)).astype(jnp.bfloat16)
    wb = (jax.random.normal(k4, (640, 384), dtype=jnp.float32) * 0.02).astype(jnp.bfloat16)
    out_b = jax.block_until_ready(inner_product(xb, wb))
    ref_b = jnp.dot(xb.astype(jnp.float32), wb.astype(jnp.float32))
    assert out_b.shape == (192, 384)
    assert out_b.dtype == jnp.bfloat16
    assert jnp.allclose(out_b.astype(jnp.float32), ref_b, atol=3e-2, rtol=3e-2), \
        "bf16 mismatch vs reference"

    print("KERNEL_OK")
</pallas_src>

<mosaic_0001>
module attributes {stable_mosaic.version = 11 : i64} {
  func.func @_innerproduct_kernel(%arg0: i32, %arg1: i32, %arg2: i32, %arg3: memref<8x128xf32, #tpu.memory_space<vmem>>, %arg4: memref<128x128xf32, #tpu.memory_space<vmem>>, %arg5: memref<8x128xf32, #tpu.memory_space<vmem>>, %arg6: memref<8x128xf32, #tpu.memory_space<vmem>>) attributes {dimension_semantics = [#tpu.dimension_semantics<parallel>, #tpu.dimension_semantics<parallel>, #tpu.dimension_semantics<arbitrary>], iteration_bounds = array<i64: 1, 1, 1>, scalar_prefetch = 0 : i64, scratch_operands = 1 : i64, tpu.core_type = #tpu.core_type<tc>, window_params = [{transform_indices = @transform_0, window_bounds = array<i64: 8, 128>}, {transform_indices = @transform_1, window_bounds = array<i64: 128, 128>}, {transform_indices = @transform_2, window_bounds = array<i64: 8, 128>}]} {
    %c0_i32 = arith.constant 0 : i32
    %0 = arith.cmpi eq, %arg2, %c0_i32 : i32
    %1 = arith.extui %0 : i1 to i32
    %c0_i32_0 = arith.constant 0 : i32
    %2 = arith.cmpi ne, %1, %c0_i32_0 : i32
    scf.if %2 {
      %cst_10 = arith.constant 0.000000e+00 : f32
      %12 = vector.broadcast %cst_10 : f32 to vector<8x128xf32>
      %c0_11 = arith.constant 0 : index
      %c0_12 = arith.constant 0 : index
      %13 = vector.load %arg6[%c0_11, %c0_12] : memref<8x128xf32, #tpu.memory_space<vmem>>, vector<8x128xf32>
      tpu.vector_store %arg6[%c0_11, %c0_12], %12 {strides = array<i32>} : memref<8x128xf32, #tpu.memory_space<vmem>>, vector<8x128xf32>,
    } else {
    }
    %c0 = arith.constant 0 : index
    %c0_1 = arith.constant 0 : index
    %3 = vector.load %arg6[%c0, %c0_1] : memref<8x128xf32, #tpu.memory_space<vmem>>, vector<8x128xf32>
    %c0_2 = arith.constant 0 : index
    %c0_3 = arith.constant 0 : index
    %4 = vector.load %arg3[%c0_2, %c0_3] : memref<8x128xf32, #tpu.memory_space<vmem>>, vector<8x128xf32>
    %c0_4 = arith.constant 0 : index
    %c0_5 = arith.constant 0 : index
    %5 = vector.load %arg4[%c0_4, %c0_5] : memref<128x128xf32, #tpu.memory_space<vmem>>, vector<128x128xf32>
    %cst = arith.constant dense<0.000000e+00> : vector<8x128xf32>
    %6 = tpu.matmul %4, %5, %cst {dimension_numbers = #tpu.dot_dimension_numbers<[1], [0], [0], [1], [0, 0, 1, 1], [], []>} : vector<8x128xf32>, vector<128x128xf32>, vector<8x128xf32> -> vector<8x128xf32>
    %7 = arith.addf %3, %6 : vector<8x128xf32>
    %c0_6 = arith.constant 0 : index
    %c0_7 = arith.constant 0 : index
    %8 = vector.load %arg6[%c0_6, %c0_7] : memref<8x128xf32, #tpu.memory_space<vmem>>, vector<8x128xf32>
    tpu.vector_store %arg6[%c0_6, %c0_7], %7 {strides = array<i32>} : memref<8x128xf32, #tpu.memory_space<vmem>>, vector<8x128xf32>,
    %c0_i32_8 = arith.constant 0 : i32
    %9 = arith.cmpi eq, %arg2, %c0_i32_8 : i32
    %10 = arith.extui %9 : i1 to i32
    %c0_i32_9 = arith.constant 0 : i32
    %11 = arith.cmpi ne, %10, %c0_i32_9 : i32
    scf.if %11 {
      %c0_10 = arith.constant 0 : index
      %c0_11 = arith.constant 0 : index
      %12 = vector.load %arg6[%c0_10, %c0_11] : memref<8x128xf32, #tpu.memory_space<vmem>>, vector<8x128xf32>
      %c0_12 = arith.constant 0 : index
      %c0_13 = arith.constant 0 : index
      %13 = vector.load %arg5[%c0_12, %c0_13] : memref<8x128xf32, #tpu.memory_space<vmem>>, vector<8x128xf32>
      tpu.vector_store %arg5[%c0_12, %c0_13], %12 {strides = array<i32>} : memref<8x128xf32, #tpu.memory_space<vmem>>, vector<8x128xf32>,
    } else {
    }
    return
  }
  func.func @transform_0(%arg0: i32, %arg1: i32, %arg2: i32) -> (i32, i32) {
    %c0_i32 = arith.constant 0 : i32
    return %arg0, %arg2 : i32, i32
  }
  func.func @transform_1(%arg0: i32, %arg1: i32, %arg2: i32) -> (i32, i32) {
    %c0_i32 = arith.constant 0 : i32
    return %arg2, %arg1 : i32, i32
  }
  func.func @transform_2(%arg0: i32, %arg1: i32, %arg2: i32) -> (i32, i32) {
    %c0_i32 = arith.constant 0 : i32
    return %arg0, %arg1 : i32, i32
  }
}

</mosaic_0001>

<bundles_post_ra>
// kernel: tpu_custom_call.1
= control target key start
LH: loop header
LB: loop body
LE: loop exit
PB: predicated region body
PF: predicated region fallthrough
CT: control target
= control target key end

     0   :  { %7 = vsyncpa [#allocation4], 0  ;;  %s376_s0 = inlined_call_operand.hbm [shape: f32[8,128], index: 0, kind: input, shape index: {}]   ;;  %s377_s1 = inlined_call_operand.hbm [shape: f32[128,128], index: 1, kind: input, shape index: {}]   ;;  %s378_s2 = inlined_call_operand.hbm [shape: f32[8,128], index: 2, kind: output, shape index: {}]  }
   0x1   :  { %8 = vsyncpa [#allocation7], 0 }
   0x2   :  { %9 = vsyncpa [#allocation5], 0  ;;  %s310_s9 = smov [#allocation3]   ;;  %s311_s11 = smov [#allocation6]  }
   0x3   :  { %s16_s10 = sshll.u32 %s310_s9, 4  ;;  %s25_s12 = sshll.u32 %s311_s11, 4  ;;  %s17_s10 = int_to_ptr.vmem [resolvable:$true] %s16_s10  ;;  %s333_s12 = int_to_ptr.vmem [resolvable:$true] %s25_s12 }
   0x4   :  { %s238_s15 = scalar_lea.hbm %s376_s0, 128 }
   0x5   :  { %p239_p0 = scmp.ne.s32.totalorder %s376_s0, %s238_s15  ;;  %p242_p1 = scmp.lt.u32.totalorder %s238_s15, %s376_s0 }
   0x7   :  { %p244_p2 = pnand %p242_p1, %p239_p0 }
   0x9   :  { %247 = shalt.err (!%p244_p2)
}
   0xa   :  { %s248_s20 = scalar_lea.vmem %s17_s10, 128  ;;  %p253_p4 = scmp.lt.s32.totalorder %s17_s10, %s17_s10 }
   0xb   :  { %p249_p3 = scmp.ne.s32.totalorder %s17_s10, %s248_s20  ;;  %p254_p5 = scmp.lt.s32.totalorder %s248_s20, %s248_s20 }
   0xd   :  { %p255_p6 = por %p254_p5, %p253_p4 }
   0xf   :  { %p256_p7 = pnand %p255_p6, %p249_p3 }
  0x11   :  { %259 = shalt.err (!%p256_p7)
}
  0x12   :  { %19 = dma.hbm_to_vmem [thread:$0]  %s376_s0, 128, %s17_s10, [#allocation4]  }
  0x13   :  { %s260_s25 = scalar_lea.hbm %s377_s1, 2048 }
  0x14   :  { %p261_p8 = scmp.ne.s32.totalorder %s377_s1, %s260_s25  ;;  %p264_p9 = scmp.lt.u32.totalorder %s260_s25, %s377_s1 }
  0x16   :  { %p266_p10 = pnand %p264_p9, %p261_p8 }
  0x18   :  { %269 = shalt.err (!%p266_p10)
}
  0x19   :  { %s270_s30 = scalar_lea.vmem %s333_s12, 2048  ;;  %p275_p12 = scmp.lt.s32.totalorder %s333_s12, %s333_s12 }
  0x1a   :  { %p271_p11 = scmp.ne.s32.totalorder %s333_s12, %s270_s30  ;;  %p276_p13 = scmp.lt.s32.totalorder %s270_s30, %s270_s30 }
  0x1c   :  { %p277_p0 = por %p276_p13, %p275_p12 }
  0x1e   :  { %p278_p1 = pnand %p277_p0, %p271_p11 }
  0x20   :  { %281 = shalt.err (!%p278_p1)
}
  0x21   :  { %s312_s0 = smov 128   ;;  %s313_s3 = smov 8  }
  0x22   :  { %31 = dma.hbm_to_vmem [thread:$0]  %s377_s1, 2048, %s333_s12, [#allocation7], %s312_s0, %s312_s0, %s313_s3  }
  0x23   :  { %304 = dma.done.wait [#allocation4], 128  }
  0x24   :  { %305 = vsyncadd [#allocation4], 4294967168 }
  0x25   :  { %306 = dma.done.wait [#allocation7], 2048  }
  0x26   :  { %307 = vsyncadd [#allocation7], 4294965248  ;;  %v314_v0 = vmov 0.0|0.0   ;;  %vm315_vm0 = vmmov 0   ;;  %v316_v1 = vmov 0.0   ;;  %v45_v2 = vld [vmem:[#allocation6] sm:$0xff] }
  0x27   :  { %206 = vmatprep.subr.bf16.mxu0 %v314_v0  ;;  %203 = vmatprep.mubr.msk.f32.mxu0 %vm315_vm0, %v316_v1  ;;  %v46_v3 = vld [vmem:[#allocation6 + $0x8] sm:$0xff]  ;;  %v47_v4 = vld [vmem:[#allocation6 + $0x10] sm:$0xff]  ;;  %v48_v6 = vld [vmem:[#allocation6 + $0x18] sm:$0xff]  ;;  %s317_s1 = smov [#allocation8]  }
  0x28   :  { %v207_v5 = vpack.c.bf16 %v46_v3, %v45_v2  ;;  %v210_v7 = vpack.c.bf16 %v48_v6, %v47_v4  ;;  %v49_v8 = vld [vmem:[#allocation6 + $0x20] sm:$0xff]  ;;  %v50_v9 = vld [vmem:[#allocation6 + $0x28] sm:$0xff]  ;;  %v51_v11 = vld [vmem:[#allocation6 + $0x30] sm:$0xff]  ;;  %s144_s6 = sshll.u32 %s317_s1, 4  ;;  %s145_s6 = int_to_ptr.vmem [resolvable:$true] %s144_s6 }
  0x29   :  { %v213_v10 = vpack.c.bf16 %v50_v9, %v49_v8  ;;  %v52_v12 = vld [vmem:[#allocation6 + $0x38] sm:$0xff]  ;;  %v53_v14 = vld [vmem:[#allocation6 + $0x40] sm:$0xff]  ;;  %v54_v15 = vld [vmem:[#allocation6 + $0x48] sm:$0xff]  ;;  %s282_s7 = scalar_lea.vmem %s145_s6, 128  ;;  %p287_p3 = scmp.lt.s32.totalorder %s145_s6, %s145_s6 }
  0x2a   :  { %208 = vmatpush3.bf16.msra.mxu0 %v207_v5  ;;  %v216_v13 = vpack.c.bf16 %v52_v12, %v51_v11  ;;  %v219_v16 = vpack.c.bf16 %v54_v15, %v53_v14  ;;  %v55_v17 = vld [vmem:[#allocation6 + $0x50] sm:$0xff]  ;;  %v56_v18 = vld [vmem:[#allocation6 + $0x58] sm:$0xff]  ;;  %v57_v20 = vld [vmem:[#allocation6 + $0x60] sm:$0xff]  ;;  %p283_p2 = scmp.ne.s32.totalorder %s145_s6, %s282_s7  ;;  %p288_p4 = scmp.lt.s32.totalorder %s282_s7, %s282_s7 }
  0x2b   :  { %209 = vmatprep.subr.bf16.mxu0 %v314_v0  ;;  %v222_v19 = vpack.c.bf16 %v56_v18, %v55_v17  ;;  %v58_v21 = vld [vmem:[#allocation6 + $0x68] sm:$0xff]  ;;  %v59_v23 = vld [vmem:[#allocation6 + $0x70] sm:$0xff]  ;;  %v60_v24 = vld [vmem:[#allocation6 + $0x78] sm:$0xff] }
  0x2c   :  { %v225_v22 = vpack.c.bf16 %v58_v21, %v57_v20  ;;  %v228_v25 = vpack.c.bf16 %v60_v24, %v59_v23  ;;  %v44_v26 = vld [vmem:[#allocation3] sm:$0xff]  ;;  %p289_p5 = por %p288_p4, %p287_p3 }
  0x2e   :  { %211 = vmatpush3.bf16.msra.mxu0 %v210_v7  ;;  %p290_p6 = pnand %p289_p5, %p283_p2 }
  0x2f   :  { %212 = vmatprep.subr.bf16.mxu0 %v314_v0 }
  0x32   :  { %214 = vmatpush3.bf16.msra.mxu0 %v213_v10 }
  0x33   :  { %215 = vmatprep.subr.bf16.mxu0 %v314_v0 }
  0x36   :  { %217 = vmatpush3.bf16.msra.mxu0 %v216_v13 }
  0x37   :  { %218 = vmatprep.subr.bf16.mxu0 %v314_v0 }
  0x3a   :  { %220 = vmatpush3.bf16.msra.mxu0 %v219_v16 }
  0x3b   :  { %221 = vmatprep.subr.bf16.mxu0 %v314_v0 }
  0x3e   :  { %223 = vmatpush3.bf16.msra.mxu0 %v222_v19 }
  0x3f   :  { %224 = vmatprep.subr.bf16.mxu0 %v314_v0 }
  0x42   :  { %226 = vmatpush3.bf16.msra.mxu0 %v225_v22 }
  0x43   :  { %227 = vmatprep.subr.bf16.mxu0 %v314_v0 }
  0x46   :  { %229 = vmatpush3.bf16.msra.mxu0 %v228_v25 }
  0x49   :  { %204 = vmatmul.mubr.f32.vlgmr.msra.gmra.mrb[0].mxu0 %v44_v26 }
 0x11c   :  { %v127_v27 = vpop.f32.mrb[0].mxu0 }
 0x11d   :  { %137 = vst [vmem:[#allocation8] sm:$0xff] %v127_v27  ;;  %v205_v28 = vpop.f32.mrb[1].mxu0 }
 0x11e   :  { %293 = shalt.err (!%p290_p6)
}
 0x11f   :  { %s294_s10 = scalar_lea.hbm %s378_s2, 128 }
 0x120   :  { %p295_p7 = scmp.ne.s32.totalorder %s378_s2, %s294_s10  ;;  %p298_p8 = scmp.lt.u32.totalorder %s294_s10, %s378_s2 }
 0x122   :  { %p300_p9 = pnand %p298_p8, %p295_p7 }
 0x124   :  { %303 = shalt.err (!%p300_p9)
}
 0x125   :  { %147 = dma.vmem_to_hbm [thread:$0]  %s145_s6, 128, %s378_s2, [#allocation5]  }
 0x126   :  { %308 = dma.done.wait [#allocation5], 128  }
 0x127   :  { %309 = vsyncadd [#allocation5], 4294967168 }
 0x128   :  { %151 = vsyncpa [#allocation4], 1 }
 0x129   :  { %152 = vsyncpa [#allocation7], 1 }
 0x12a   :  { %153 = vsyncpa [#allocation5], 1 }

</bundles_post_ra>
